<compile_context>
chip_gen: v7x
topology: tpu7x:2x2x1
jax: 0.10.0
libtpu: 0.0.40
codegen_flags: <defaults>
</compile_context>

<pallas_src>
import functools

import jax
import jax.numpy as jnp
from jax import lax
from jax.experimental import pallas as pl
from jax.experimental.pallas import tpu as pltpu


# --------------------------------------------------------------------------
# Kernels
# --------------------------------------------------------------------------
def _gram_kernel(fr_ref, fc_ref, g_ref, *, inv_denom, k_dim, tk, mask_k):
    """(i, j, k) grid: accumulates F_i @ F_j^T over K directly into the resident
    output block; scales by inv_denom on the last K step."""
    k = pl.program_id(2)
    nk = pl.num_programs(2)

    @pl.when(k == 0)
    def _():
        g_ref[...] = jnp.zeros_like(g_ref)

    a = fr_ref[...]                                       # (tm, tk)
    b = fc_ref[...]                                       # (tn, tk)
    if mask_k:  # static: only emitted when K % tk != 0
        keep = (k * tk + lax.broadcasted_iota(jnp.int32, (1, tk), 1)) < k_dim
        a = jnp.where(keep, a, 0)
        b = jnp.where(keep, b, 0)

    # Contract the last dim of both operands (A @ B^T) on the MXU.
    # TODO(synk): confirm via pl.lower_as_mlir that no per-step vxpose is emitted.
    g_ref[...] += lax.dot_general(
        a, b,
        dimension_numbers=(((1,), (1,)), ((), ())),
        preferred_element_type=jnp.float32,
    )

    @pl.when(k == nk - 1)
    def _():
        g_ref[...] = g_ref[...] * inv_denom


def _style_loss_kernel(ti_ref, tj_ref, fr_ref, fc_ref, tgt_ref, loss_ref,
                       acc_ref, sse_ref, *,
                       inv_denom, inv_nelem, k_dim, tk, m, tm, mask_k, mask_m):
    """(t, k) grid over upper-triangular tile pairs (scalar-prefetched indices).
    Per-tile gram accumulates in VMEM; MSE partial sums accumulate in an SMEM
    scalar (off-diagonal tiles weighted 2x by symmetry).  Gram never hits HBM."""
    t = pl.program_id(0)
    k = pl.program_id(1)
    nt = pl.num_programs(0)
    nk = pl.num_programs(1)

    @pl.when(jnp.logical_and(t == 0, k == 0))
    def _():
        sse_ref[0] = jnp.float32(0.0)

    @pl.when(k == 0)
    def _():
        acc_ref[...] = jnp.zeros_like(acc_ref)

    a = fr_ref[...]                                       # (tm, tk)
    b = fc_ref[...]                                       # (tm, tk)
    if mask_k:  # static: only emitted when K % tk != 0
        keep = (k * tk + lax.broadcasted_iota(jnp.int32, (1, tk), 1)) < k_dim
        a = jnp.where(keep, a, 0)
        b = jnp.where(keep, b, 0)

    acc_ref[...] += lax.dot_general(
        a, b,
        dimension_numbers=(((1,), (1,)), ((), ())),
        preferred_element_type=jnp.float32,
    )

    @pl.when(k == nk - 1)
    def _():
        i = ti_ref[t]
        j = tj_ref[t]
        diff = acc_ref[...] * inv_denom - tgt_ref[...].astype(jnp.float32)
        sq = diff * diff
        if mask_m:  # static: only emitted when m % tm != 0
            row = i * tm + lax.broadcasted_iota(jnp.int32, acc_ref.shape, 0)
            col = j * tm + lax.broadcasted_iota(jnp.int32, acc_ref.shape, 1)
            sq = jnp.where(jnp.logical_and(row < m, col < m), sq, 0.0)
        # Off-diagonal tile (i, j) stands in for (j, i) too -> weight 2.
        weight = jnp.where(i == j, jnp.float32(1.0), jnp.float32(2.0))
        sse_ref[0] += weight * jnp.sum(sq)

        @pl.when(t == nt - 1)
        def _():
            loss_ref[0] = sse_ref[0] * inv_nelem


# --------------------------------------------------------------------------
# Tiling helpers
# --------------------------------------------------------------------------
def _choose_tiles(m, k_dim):
    """Square output tile (<=256 fills the v6e/v7x MXU; 128-mult for v5e) and
    a large K tile (full K when <= 2048, else 2048 = 16 x 128)."""
    tm = m if m <= 256 else 256
    tk = k_dim if k_dim <= 2048 else 2048
    return tm, tk


def _prep_features(x):
    """(B,H,W,F) -> (m, K) features.  Reshape only (no HBM copy, no K padding);
    bf16 stays bf16 (MXU-native, f32 accumulation), everything else -> f32."""
    b, h, w, f = x.shape
    m = b * h
    k_dim = w * f
    dt = x.dtype
    if dt != jnp.bfloat16 and dt != jnp.float32:
        dt = jnp.float32
    feats = x.reshape(m, k_dim).astype(dt)
    denom = float(b * h * w * f)
    return feats, m, k_dim, denom


def _vmem_limit(buffer_bytes):
    """Explicit scoped-VMEM request: 2x headroom, 16 MiB floor, <= 60 MiB."""
    return int(min(max(2 * buffer_bytes + (1 << 20), 16 << 20), 60 << 20))


# --------------------------------------------------------------------------
# Wrappers
# --------------------------------------------------------------------------
def gram_matrix(x):
    """Normalized gram matrix of a (B, H, W, F) feature map (Pallas kernel)."""
    feats, m, k_dim, denom = _prep_features(x)
    tm, tk = _choose_tiles(m, k_dim)
    nt = pl.cdiv(m, tm)
    nk = pl.cdiv(k_dim, tk)
    isz = jnp.dtype(feats.dtype).itemsize
    vmem = _vmem_limit(2 * 2 * tm * tk * isz          # 2 feature tiles, 2 buffers
                       + 2 * tm * tm * 4)             # resident output tile

    kernel = functools.partial(
        _gram_kernel, inv_denom=1.0 / denom, k_dim=k_dim, tk=tk,
        mask_k=(k_dim % tk != 0))

    return pl.pallas_call(
        kernel,
        out_shape=jax.ShapeDtypeStruct((m, m), jnp.float32),
        grid_spec=pltpu.PrefetchScalarGridSpec(
            num_scalar_prefetch=0,
            grid=(nt, nt, nk),                                  # K innermost
            in_specs=[
                pl.BlockSpec((tm, tk), lambda i, j, k: (i, k)),  # row tile
                pl.BlockSpec((tm, tk), lambda i, j, k: (j, k)),  # col tile
            ],
            out_specs=pl.BlockSpec((tm, tm), lambda i, j, k: (i, j)),
        ),
        compiler_params=pltpu.CompilerParams(
            dimension_semantics=("parallel", "parallel", "arbitrary"),
            vmem_limit_bytes=vmem,
        ),
    )(feats, feats)


def style_loss(x, target):
    """mean((gram_matrix(x) - target)^2); the gram stays in VMEM (never HBM)."""
    feats, m, k_dim, denom = _prep_features(x)
    tm, tk = _choose_tiles(m, k_dim)
    nt = pl.cdiv(m, tm)
    nk = pl.cdiv(k_dim, tk)
    isz = jnp.dtype(feats.dtype).itemsize

    # Upper-triangular tile pairs only (G = G^T): ~2x less MXU work.
    pairs = [(i, j) for i in range(nt) for j in range(i, nt)]
    ti = jnp.asarray([p[0] for p in pairs], dtype=jnp.int32)
    tj = jnp.asarray([p[1] for p in pairs], dtype=jnp.int32)

    vmem = _vmem_limit(2 * 2 * tm * tk * isz          # 2 feature tiles, 2 buffers
                       + 2 * tm * tm * 4              # target tile, 2 buffers
                       + tm * tm * 4)                 # gram accumulator scratch

    kernel = functools.partial(
        _style_loss_kernel,
        inv_denom=1.0 / denom, inv_nelem=1.0 / float(m * m),
        k_dim=k_dim, tk=tk, m=m, tm=tm,
        mask_k=(k_dim % tk != 0), mask_m=(m % tm != 0))

    loss = pl.pallas_call(
        kernel,
        out_shape=jax.ShapeDtypeStruct((1,), jnp.float32),
        grid_spec=pltpu.PrefetchScalarGridSpec(
            num_scalar_prefetch=2,                              # ti, tj in SMEM
            grid=(len(pairs), nk),                              # K innermost
            in_specs=[
                pl.BlockSpec((tm, tk), lambda t, k, ti, tj: (ti[t], k)),
                pl.BlockSpec((tm, tk), lambda t, k, ti, tj: (tj[t], k)),
                pl.BlockSpec((tm, tm), lambda t, k, ti, tj: (ti[t], tj[t])),
            ],
            out_specs=pl.BlockSpec(memory_space=pltpu.MemorySpace.SMEM),
            scratch_shapes=[
                pltpu.VMEM((tm, tm), jnp.float32),   # per-tile gram accumulator
                pltpu.SMEM((1,), jnp.float32),       # running sum of squared errors
            ],
        ),
        compiler_params=pltpu.CompilerParams(
            # The SSE scalar is carried across tile pairs -> serial axes.
            dimension_semantics=("arbitrary", "arbitrary"),
            vmem_limit_bytes=vmem,
        ),
    )(ti, tj, feats, feats, target.astype(jnp.float32))
    return loss[0]


class StyleLoss:
    """JAX/Pallas port of the PyTorch StyleLoss module (forward only)."""

    def __init__(self, target_feature):
        self.target = gram_matrix(target_feature)     # detached by construction
        # F.mse_loss(self.target, self.target) == 0
        self.loss = jnp.float32(0.0)

    def __call__(self, x):
        self.loss = style_loss(x, self.target)
        return x


# --------------------------------------------------------------------------
# Reference + test
# --------------------------------------------------------------------------
def _gram_ref(x):
    b, h, w, f = x.shape
    feats = x.reshape(b * h, w * f).astype(jnp.float32)
    g = jnp.dot(feats, feats.T, precision=jax.lax.Precision.HIGHEST)
    return g / (b * h * w * f)


def _check(B, H, W, F, key):
    k1, k2 = jax.random.split(key)
    target_feature = jax.random.normal(k1, (B, H, W, F), dtype=jnp.float32)
    x = jax.random.normal(k2, (B, H, W, F), dtype=jnp.float32)

    style = StyleLoss(target_feature)
    out = jax.block_until_ready(style(x))
    loss = jax.block_until_ready(style.loss)

    g_ref = _gram_ref(x)
    t_ref = _gram_ref(target_feature)
    loss_ref = jnp.mean((g_ref - t_ref) ** 2)
    assert out.shape == x.shape and jnp.allclose(out, x)
    assert jnp.allclose(style.target, t_ref, rtol=1e-4, atol=1e-5)
    assert jnp.allclose(loss, loss_ref, rtol=2e-2, atol=1e-9), (loss, loss_ref)


if __name__ == "__main__":
    key = jax.random.PRNGKey(0)
    k1, k2 = jax.random.split(key)

    # Small shape consistent with the module's (B, H, W, F) unpacking:
    # m = 32, K = 256 -> single output tile, single K step.
    _check(2, 16, 16, 16, k1)

    # Multi-tile path: m = 320 (> 256) -> 2x2 output tiling in the gram path,
    # 3 upper-triangular tile pairs with 2x weighting in the loss path, and
    # in-kernel masking of the M remainder.
    _check(2, 160, 8, 48, k2)

    print("KERNEL_OK")
</pallas_src>

<mosaic_0001>
module attributes {stable_mosaic.version = 11 : i64} {
  func.func @_gram_kernel(%arg0: i32, %arg1: i32, %arg2: i32, %arg3: memref<32x256xf32, #tpu.memory_space<vmem>>, %arg4: memref<32x256xf32, #tpu.memory_space<vmem>>, %arg5: memref<32x32xf32, #tpu.memory_space<vmem>>) attributes {dimension_semantics = [#tpu.dimension_semantics<parallel>, #tpu.dimension_semantics<parallel>, #tpu.dimension_semantics<arbitrary>], iteration_bounds = array<i64: 1, 1, 1>, scalar_prefetch = 0 : i64, scratch_operands = 0 : i64, tpu.core_type = #tpu.core_type<tc>, window_params = [{transform_indices = @transform_0, window_bounds = array<i64: 32, 256>}, {transform_indices = @transform_1, window_bounds = array<i64: 32, 256>}, {transform_indices = @transform_2, window_bounds = array<i64: 32, 32>}]} {
    %c0_i32 = arith.constant 0 : i32
    %0 = arith.cmpi eq, %arg2, %c0_i32 : i32
    %1 = arith.extui %0 : i1 to i32
    %c0_i32_0 = arith.constant 0 : i32
    %2 = arith.cmpi ne, %1, %c0_i32_0 : i32
    scf.if %2 {
      %cst_10 = arith.constant 0.000000e+00 : f32
      %12 = vector.broadcast %cst_10 : f32 to vector<32x32xf32>
      %c0_11 = arith.constant 0 : index
      %c0_12 = arith.constant 0 : index
      %13 = vector.load %arg5[%c0_11, %c0_12] : memref<32x32xf32, #tpu.memory_space<vmem>>, vector<32x32xf32>
      tpu.vector_store %arg5[%c0_11, %c0_12], %12 {strides = array<i32>} : memref<32x32xf32, #tpu.memory_space<vmem>>, vector<32x32xf32>,
    } else {
    }
    %c0 = arith.constant 0 : index
    %c0_1 = arith.constant 0 : index
    %3 = vector.load %arg3[%c0, %c0_1] : memref<32x256xf32, #tpu.memory_space<vmem>>, vector<32x256xf32>
    %c0_2 = arith.constant 0 : index
    %c0_3 = arith.constant 0 : index
    %4 = vector.load %arg4[%c0_2, %c0_3] : memref<32x256xf32, #tpu.memory_space<vmem>>, vector<32x256xf32>
    %c0_4 = arith.constant 0 : index
    %c0_5 = arith.constant 0 : index
    %5 = vector.load %arg5[%c0_4, %c0_5] : memref<32x32xf32, #tpu.memory_space<vmem>>, vector<32x32xf32>
    %cst = arith.constant dense<0.000000e+00> : vector<32x32xf32>
    %6 = tpu.matmul %3, %4, %cst {dimension_numbers = #tpu.dot_dimension_numbers<[1], [1], [0], [0], [0, 0, 1, 0], [], []>} : vector<32x256xf32>, vector<32x256xf32>, vector<32x32xf32> -> vector<32x32xf32>
    %7 = arith.addf %5, %6 : vector<32x32xf32>
    %c0_6 = arith.constant 0 : index
    %c0_7 = arith.constant 0 : index
    %8 = vector.load %arg5[%c0_6, %c0_7] : memref<32x32xf32, #tpu.memory_space<vmem>>, vector<32x32xf32>
    tpu.vector_store %arg5[%c0_6, %c0_7], %7 {strides = array<i32>} : memref<32x32xf32, #tpu.memory_space<vmem>>, vector<32x32xf32>,
    %c0_i32_8 = arith.constant 0 : i32
    %9 = arith.cmpi eq, %arg2, %c0_i32_8 : i32
    %10 = arith.extui %9 : i1 to i32
    %c0_i32_9 = arith.constant 0 : i32
    %11 = arith.cmpi ne, %10, %c0_i32_9 : i32
    scf.if %11 {
      %c0_10 = arith.constant 0 : index
      %c0_11 = arith.constant 0 : index
      %12 = vector.load %arg5[%c0_10, %c0_11] : memref<32x32xf32, #tpu.memory_space<vmem>>, vector<32x32xf32>
      %cst_12 = arith.constant 1.22070313E-4 : f32
      %13 = vector.broadcast %cst_12 : f32 to vector<32x32xf32>
      %14 = arith.mulf %12, %13 : vector<32x32xf32>
      %c0_13 = arith.constant 0 : index
      %c0_14 = arith.constant 0 : index
      %15 = vector.load %arg5[%c0_13, %c0_14] : memref<32x32xf32, #tpu.memory_space<vmem>>, vector<32x32xf32>
      tpu.vector_store %arg5[%c0_13, %c0_14], %14 {strides = array<i32>} : memref<32x32xf32, #tpu.memory_space<vmem>>, vector<32x32xf32>,
    } else {
    }
    return
  }
  func.func @transform_0(%arg0: i32, %arg1: i32, %arg2: i32) -> (i32, i32) {
    %c0_i32 = arith.constant 0 : i32
    return %arg0, %arg2 : i32, i32
  }
  func.func @transform_1(%arg0: i32, %arg1: i32, %arg2: i32) -> (i32, i32) {
    %c0_i32 = arith.constant 0 : i32
    return %arg1, %arg2 : i32, i32
  }
  func.func @transform_2(%arg0: i32, %arg1: i32, %arg2: i32) -> (i32, i32) {
    %c0_i32 = arith.constant 0 : i32
    return %arg0, %arg1 : i32, i32
  }
}

</mosaic_0001>

<bundles_post_ra>
// kernel: tpu_custom_call.1
= control target key start
LH: loop header
LB: loop body
LE: loop exit
PB: predicated region body
PF: predicated region fallthrough
CT: control target
= control target key end

     0   :  { %7 = vsyncpa [#allocation3], 0  ;;  %s359_s0 = inlined_call_operand.hbm [shape: f32[32,256], index: 0, kind: input, shape index: {}]   ;;  %s360_s1 = inlined_call_operand.hbm [shape: f32[32,256], index: 1, kind: input, shape index: {}]   ;;  %s361_s2 = inlined_call_operand.hbm [shape: f32[32,32], index: 2, kind: output, shape index: {}]  }
   0x1   :  { %8 = vsyncpa [#allocation6], 0 }
   0x2   :  { %9 = vsyncpa [#allocation4], 0  ;;  %s288_s9 = smov [#allocation2]   ;;  %s216_s13 = scalar_lea.hbm %s359_s0, 1024 }
   0x3   :  { %s15_s10 = sshll.u32 %s288_s9, 4  ;;  %p217_p0 = scmp.ne.s32.totalorder %s359_s0, %s216_s13  ;;  %s16_s10 = int_to_ptr.vmem [resolvable:$true] %s15_s10 }
   0x4   :  { %p220_p1 = scmp.lt.u32.totalorder %s216_s13, %s359_s0 }
   0x6   :  { %p222_p2 = pnand %p220_p1, %p217_p0 }
   0x8   :  { %225 = shalt.err (!%p222_p2)
}
   0x9   :  { %s226_s18 = scalar_lea.vmem %s16_s10, 1024  ;;  %p231_p4 = scmp.lt.s32.totalorder %s16_s10, %s16_s10 }
   0xa   :  { %p227_p3 = scmp.ne.s32.totalorder %s16_s10, %s226_s18  ;;  %p232_p5 = scmp.lt.s32.totalorder %s226_s18, %s226_s18 }
   0xc   :  { %p233_p6 = por %p232_p5, %p231_p4 }
   0xe   :  { %p234_p7 = pnand %p233_p6, %p227_p3 }
  0x10   :  { %237 = shalt.err (!%p234_p7)
}
  0x11   :  { %s289_s19 = smov 256   ;;  %s290_s20 = smov 16  }
  0x12   :  { %21 = dma.hbm_to_vmem [thread:$0]  %s359_s0, 1024, %s16_s10, [#allocation3], %s289_s19, %s289_s19, %s290_s20  }
  0x13   :  { %s291_s23 = smov [#allocation5]   ;;  %s238_s27 = scalar_lea.hbm %s360_s1, 1024 }
  0x14   :  { %s27_s24 = sshll.u32 %s291_s23, 4  ;;  %p239_p8 = scmp.ne.s32.totalorder %s360_s1, %s238_s27  ;;  %s28_s24 = int_to_ptr.vmem [resolvable:$true] %s27_s24 }
  0x15   :  { %p242_p9 = scmp.lt.u32.totalorder %s238_s27, %s360_s1 }
  0x17   :  { %p244_p10 = pnand %p242_p9, %p239_p8 }
  0x19   :  { %247 = shalt.err (!%p244_p10)
}
  0x1a   :  { %s248_s4 = scalar_lea.vmem %s28_s24, 1024  ;;  %p253_p12 = scmp.lt.s32.totalorder %s28_s24, %s28_s24 }
  0x1b   :  { %p249_p11 = scmp.ne.s32.totalorder %s28_s24, %s248_s4  ;;  %p254_p13 = scmp.lt.s32.totalorder %s248_s4, %s248_s4 }
  0x1d   :  { %p255_p0 = por %p254_p13, %p253_p12 }
  0x1f   :  { %p256_p1 = pnand %p255_p0, %p249_p11 }
  0x21   :  { %259 = shalt.err (!%p256_p1)
}
  0x22   :  { %33 = dma.hbm_to_vmem [thread:$0]  %s360_s1, 1024, %s28_s24, [#allocation6], %s289_s19, %s289_s19, %s290_s20  }
  0x23   :  { %282 = dma.done.wait [#allocation3], 1024  }
  0x24   :  { %283 = vsyncadd [#allocation3], 4294966272 }
  0x25   :  { %284 = dma.done.wait [#allocation6], 1024  }
  0x26   :  { %285 = vsyncadd [#allocation6], 4294966272  ;;  %vm44_vm0 = vcmask 261120   ;;  %v292_v0 = vmov 0.0   ;;  %v58_v1 = vld [vmem:[#allocation5 + $0x8] sm:$0xff]  ;;  %v60_v2 = vld [vmem:[#allocation5 + $0x18] sm:$0xff] }
  0x27   :  { %45 = vst.msk [vmem:[#allocation7] sm:$0xff] %vm44_vm0, %v292_v0  ;;  %46 = vst.msk [vmem:[#allocation7 + $0x8] sm:$0xff] %vm44_vm0, %v292_v0  ;;  %v57_v3 = vld [vmem:[#allocation5] sm:$0xff]  ;;  %v196_v4 = vpack.c.bf16 %v60_v2, %v58_v1  ;;  %v59_v5 = vld [vmem:[#allocation5 + $0x10] sm:$0xff]  ;;  %s293_s1 = smov [#allocation7]  }
  0x28   :  { %47 = vst.msk [vmem:[#allocation7 + $0x10] sm:$0xff] %vm44_vm0, %v292_v0  ;;  %48 = vst.msk [vmem:[#allocation7 + $0x18] sm:$0xff] %vm44_vm0, %v292_v0  ;;  %v62_v6 = vld [vmem:[#allocation5 + $0x28] sm:$0xff]  ;;  %v64_v7 = vld [vmem:[#allocation5 + $0x38] sm:$0xff]  ;;  %v198_v8 = vpack.c.bf16 %v59_v5, %v57_v3  ;;  %s183_s6 = sshll.u32 %s293_s1, 4  ;;  %s184_s6 = int_to_ptr.vmem [resolvable:$true] %s183_s6 }
  0x29   :  { %v200_v9 = vpack.c.bf16 %v64_v7, %v62_v6  ;;  %197 = vmatprep.subr.bf16.mxu0 %v196_v4  ;;  %204 = vmatprep.subr.bf16.mxu1 %v196_v4  ;;  %v50_v10 = vld [vmem:[#allocation2 + $0x8] sm:$0xff]  ;;  %v61_v12 = vld [vmem:[#allocation5 + $0x20] sm:$0xff]  ;;  %v63_v13 = vld [vmem:[#allocation5 + $0x30] sm:$0xff]  ;;  %s260_s7 = scalar_lea.vmem %s184_s6, 512  ;;  %p265_p3 = scmp.lt.s32.totalorder %s184_s6, %s184_s6 }
  0x2a   :  { %v54_v11 = vld [vmem:[#allocation2 + $0x28] sm:$0xff]  ;;  %199 = vmatpush1.bf16.xpose.msra.mxu0 %v198_v8  ;;  %206 = vmatpush1.bf16.xpose.msra.mxu1 %v198_v8  ;;  %v202_v14 = vpack.c.bf16 %v63_v13, %v61_v12  ;;  %v49_v15 = vld [vmem:[#allocation2] sm:$0xff]  ;;  %v52_v17 = vld [vmem:[#allocation2 + $0x18] sm:$0xff]  ;;  %p261_p2 = scmp.ne.s32.totalorder %s184_s6, %s260_s7  ;;  %p266_p4 = scmp.lt.s32.totalorder %s260_s7, %s260_s7 }
  0x2b   :  { %201 = vmatprep.subr.bf16.mxu0 %v200_v9  ;;  %205 = vmatprep.subr.bf16.mxu1 %v200_v9  ;;  %v53_v16 = vld [vmem:[#allocation2 + $0x20] sm:$0xff]  ;;  %v56_v18 = vld [vmem:[#allocation2 + $0x38] sm:$0xff]  ;;  %v51_v19 = vld [vmem:[#allocation2 + $0x10] sm:$0xff] }
  0x2c   :  { %133 = vmatprep.mubr.f32.mxu0 %v50_v10  ;;  %143 = vmatprep.mubr.f32.mxu1 %v54_v11  ;;  %v55_v20 = vld [vmem:[#allocation2 + $0x30] sm:$0xff]  ;;  %p267_p5 = por %p266_p4, %p265_p3 }
  0x2e   :  { %v65_v21 = vld [vmem:[#allocation7] sm:$0xff]  ;;  %v66_v29 = vld [vmem:[#allocation7 + $0x8] sm:$0xff]  ;;  %p268_p6 = pnand %p267_p5, %p261_p2 }
  0x2f   :  { %v67_v22 = vld [vmem:[#allocation7 + $0x10] sm:$0xff]  ;;  %v68_v30 = vld [vmem:[#allocation7 + $0x18] sm:$0xff] }
  0x32   :  { %203 = vmatpush1.bf16.xpose.msra.mxu0 %v202_v14  ;;  %207 = vmatpush1.bf16.xpose.msra.mxu1 %v202_v14 }
  0x39   :  { %134 = vmatmul.mubr.f32.vlgmr.msra.gmra.mrb[0].mxu0 %v49_v15  ;;  %144 = vmatmul.mubr.f32.vlgmr.msra.gmra.mrb[0].mxu1 %v53_v16 }
  0x3a   :  { %138 = vmatprep.mubr.f32.mxu0 %v52_v17  ;;  %148 = vmatprep.mubr.f32.mxu1 %v56_v18 }
  0x3d   :  { %139 = vmatmul.mubr.f32.gmra.mrb[2].mxu0 %v51_v19  ;;  %149 = vmatmul.mubr.f32.gmra.mrb[2].mxu1 %v55_v20 }
 0x10c   :  { %v135_v23 = vpop.f32.mrb[0].mxu0  ;;  %v145_v24 = vpop.f32.mrb[0].mxu1 }
 0x10d   :  { %v154_v25 = vadd.f32 %v135_v23, %v65_v21  ;;  %v156_v26 = vadd.f32 %v145_v24, %v67_v22  ;;  %v137_v27 = vpop.f32.mrb[1].mxu0  ;;  %v147_v28 = vpop.f32.mrb[1].mxu1 }
 0x10f   :  { %159 = vst.msk [vmem:[#allocation7] sm:$0xff] %vm44_vm0, %v154_v25  ;;  %161 = vst.msk [vmem:[#allocation7 + $0x10] sm:$0xff] %vm44_vm0, %v156_v26 }
 0x110   :  { %v140_v31 = vpop.f32.mrb[2].mxu0  ;;  %v150_v32 = vpop.f32.mrb[2].mxu1 }
 0x111   :  { %v155_v33 = vadd.f32 %v140_v31, %v66_v29  ;;  %v157_v34 = vadd.f32 %v150_v32, %v68_v30  ;;  %v142_v35 = vpop.f32.mrb[3].mxu0  ;;  %v152_v36 = vpop.f32.mrb[3].mxu1 }
 0x113   :  { %160 = vst.msk [vmem:[#allocation7 + $0x8] sm:$0xff] %vm44_vm0, %v155_v33  ;;  %162 = vst.msk [vmem:[#allocation7 + $0x18] sm:$0xff] %vm44_vm0, %v157_v34 }
 0x116   :  { %v166_v37 = vld [vmem:[#allocation7] sm:$0xff]  ;;  %v168_v38 = vld [vmem:[#allocation7 + $0x10] sm:$0xff] }
 0x117   :  { %v170_v39 = vmul.f32 0.00012207031, %v166_v37  ;;  %v172_v40 = vmul.f32 0.00012207031, %v168_v38 }
 0x119   :  { %174 = vst.msk [vmem:[#allocation7] sm:$0xff] %vm44_vm0, %v170_v39  ;;  %176 = vst.msk [vmem:[#allocation7 + $0x10] sm:$0xff] %vm44_vm0, %v172_v40 }
 0x11a   :  { %v167_v41 = vld [vmem:[#allocation7 + $0x8] sm:$0xff]  ;;  %v169_v42 = vld [vmem:[#allocation7 + $0x18] sm:$0xff] }
 0x11b   :  { %v171_v43 = vmul.f32 0.00012207031, %v167_v41  ;;  %v173_v44 = vmul.f32 0.00012207031, %v169_v42 }
 0x11d   :  { %175 = vst.msk [vmem:[#allocation7 + $0x8] sm:$0xff] %vm44_vm0, %v171_v43  ;;  %177 = vst.msk [vmem:[#allocation7 + $0x18] sm:$0xff] %vm44_vm0, %v173_v44 }
 0x11e   :  { %271 = shalt.err (!%p268_p6)
}
 0x11f   :  { %s272_s10 = scalar_lea.hbm %s361_s2, 512 }
 0x120   :  { %p273_p7 = scmp.ne.s32.totalorder %s361_s2, %s272_s10  ;;  %p276_p8 = scmp.lt.u32.totalorder %s272_s10, %s361_s2 }
 0x122   :  { %p278_p9 = pnand %p276_p8, %p273_p7 }
 0x124   :  { %281 = shalt.err (!%p278_p9)
}
 0x125   :  { %s294_s15 = smov 128   ;;  %s295_s16 = smov 8  }
 0x126   :  { %189 = dma.vmem_to_hbm [thread:$0]  %s184_s6, 512, %s361_s2, [#allocation4], %s294_s15, %s294_s15, %s295_s16  }
 0x127   :  { %286 = dma.done.wait [#allocation4], 512  }
 0x128   :  { %287 = vsyncadd [#allocation4], 4294966784 }
 0x129   :  { %193 = vsyncpa [#allocation3], 1 }
 0x12a   :  { %194 = vsyncpa [#allocation6], 1 }
 0x12b   :  { %195 = vsyncpa [#allocation4], 1 }

</bundles_post_ra>
